<compile_context>
chip_gen: v6e
topology: v6e:2x2x1
jax: 0.10.0
libtpu: 0.0.40
codegen_flags: <defaults>
</compile_context>

<pallas_src>
import numpy as np
import jax
import jax.numpy as jnp
from jax.experimental import pallas as pl
from jax.experimental.pallas import tpu as pltpu


def _pick_blocks(B, C_in, C_out, HW, in_itemsize, out_itemsize=4,
                 budget_bytes=4 * 1024 * 1024):
    """Choose (batch_block, spatial_block) so one in+out block set stays under
    `budget_bytes` (double-buffering => ~2x that in VMEM; safe on all gens)."""
    # Spatial block candidates: full H*W, else multiples of 128 dividing H*W.
    hw_cands = [HW]
    if HW % 128 == 0 and HW > 128:
        hw_cands += [d for d in range(HW - 128, 127, -128) if HW % d == 0]
    b_cands = [d for d in range(B, 0, -1) if B % d == 0]

    def step_bytes(b_blk, hw_blk):
        return b_blk * hw_blk * (C_in * in_itemsize + C_out * out_itemsize)

    for hw_blk in hw_cands:            # prefer long contiguous spatial rows
        for b_blk in b_cands:          # then as many batch rows as fit
            if step_bytes(b_blk, hw_blk) <= budget_bytes:
                return b_blk, hw_blk
    return 1, hw_cands[-1]             # fallback: smallest option


def channel_expand(x, channel_num, idx=None, *, allow_shortcut=True):
    """Forward of ChannelExpand: out = zeros(B, channel_num, H, W); out[:, idx] = x."""
    B, C_in, H, W = x.shape
    if idx is None:
        idx = np.arange(channel_num)                      # matches module __init__
    idx = np.asarray(idx, dtype=np.int64)
    assert idx.ndim == 1 and idx.shape[0] == C_in, "x must have len(idx) channels"
    assert np.all((0 <= idx) & (idx < channel_num)), "idx out of range"
    assert np.unique(idx).size == C_in, "idx must be unique for a well-defined scatter"

    out_dtype = jnp.float32   # torch.zeros default dtype (intentional even for bf16 x)

    # Fast path: identity scatter == plain cast; skip the extra HBM round trip.
    if allow_shortcut and channel_num == C_in and np.array_equal(idx, np.arange(channel_num)):
        return x.astype(out_dtype)

    HW = H * W
    x2 = x.reshape(B, C_in, HW)        # free: NCHW is contiguous over (H, W)

    # Static inverse map: output channel -> source input channel (-1 => zero-fill).
    src = np.full((channel_num,), -1, dtype=np.int64)
    src[idx] = np.arange(C_in)

    # Compress into maximal runs (host side, fully static).
    copy_runs, zero_runs = [], []
    j = 0
    while j < channel_num:
        if src[j] < 0:
            k = j
            while k < channel_num and src[k] < 0:
                k += 1
            zero_runs.append((j, k - j))
        else:
            k = j
            while k + 1 < channel_num and src[k + 1] == src[k] + 1:
                k += 1
            k += 1
            copy_runs.append((j, int(src[j]), k - j))
        j = k

    b_blk, hw_blk = _pick_blocks(B, C_in, channel_num, HW, x.dtype.itemsize)

    def kernel(x_ref, o_ref):
        # x_ref: (b_blk, C_in, hw_blk)   o_ref: (b_blk, channel_num, hw_blk)
        for (o0, c0, length) in copy_runs:
            o_ref[:, o0:o0 + length, :] = x_ref[:, c0:c0 + length, :].astype(o_ref.dtype)
        for (o0, length) in zero_runs:
            o_ref[:, o0:o0 + length, :] = jnp.zeros((b_blk, length, hw_blk), o_ref.dtype)

    grid = (B // b_blk, HW // hw_blk)
    grid_spec = pltpu.PrefetchScalarGridSpec(
        num_scalar_prefetch=0,
        grid=grid,
        in_specs=[
            # Only the real input channels are ever read (zero channels are
            # produced in-kernel, no bogus input DMA).
            pl.BlockSpec((b_blk, C_in, hw_blk), lambda bi, si: (bi, 0, si)),
        ],
        out_specs=pl.BlockSpec((b_blk, channel_num, hw_blk), lambda bi, si: (bi, 0, si)),
    )

    out2 = pl.pallas_call(
        kernel,
        out_shape=jax.ShapeDtypeStruct((B, channel_num, HW), out_dtype),
        grid_spec=grid_spec,
        compiler_params=pltpu.CompilerParams(
            # Both grid axes are fully independent -> shardable across TCs (v7x).
            dimension_semantics=("parallel", "parallel"),
            # Explicit scoped-VMEM limit with headroom; blocks are sized so the
            # double-buffered in+out footprint stays well below this on v5e/v6e/v7x.
            vmem_limit_bytes=32 * 1024 * 1024,
        ),
    )(x2)
    return out2.reshape(B, channel_num, H, W)


if __name__ == "__main__":
    key = jax.random.PRNGKey(0)
    k1, k2 = jax.random.split(key)
    B, H, W = 2, 16, 16

    # Case 1: module default (idx = arange(channel_num), C_in == channel_num).
    # Exercise both the shortcut and the Pallas kernel on the identity mapping.
    C1 = 4
    x1 = jax.random.normal(k1, (B, C1, H, W), dtype=jnp.float32)
    ref1 = jnp.zeros((B, C1, H, W), jnp.float32).at[:, np.arange(C1), :, :].set(x1)
    out1_fast = jax.block_until_ready(channel_expand(x1, C1))
    out1_krnl = jax.block_until_ready(channel_expand(x1, C1, allow_shortcut=False))
    assert out1_fast.shape == (B, C1, H, W) and out1_fast.dtype == jnp.float32
    assert out1_krnl.shape == (B, C1, H, W) and out1_krnl.dtype == jnp.float32
    assert jnp.allclose(out1_fast, ref1), "identity fast path mismatch"
    assert jnp.allclose(out1_krnl, ref1), "identity kernel path mismatch"

    # Case 2: true channel expansion with a non-contiguous (pruning-style) idx.
    C_in, C_out = 4, 8
    idx = np.array([1, 2, 5, 6], dtype=np.int32)
    x2 = jax.random.normal(k2, (B, C_in, H, W), dtype=jnp.float32)
    out2 = jax.block_until_ready(channel_expand(x2, C_out, idx))
    ref2 = jnp.zeros((B, C_out, H, W), jnp.float32).at[:, idx, :, :].set(x2)
    assert out2.shape == (B, C_out, H, W) and out2.dtype == jnp.float32
    assert jnp.allclose(out2, ref2), "expansion scatter mismatch"

    print("KERNEL_OK")
</pallas_src>

<mosaic_0001>
module attributes {stable_mosaic.version = 11 : i64} {
  func.func @kernel(%arg0: i32, %arg1: i32, %arg2: memref<2x4x256xf32, #tpu.memory_space<vmem>>, %arg3: memref<2x4x256xf32, #tpu.memory_space<vmem>>) attributes {dimension_semantics = [#tpu.dimension_semantics<parallel>, #tpu.dimension_semantics<parallel>], iteration_bounds = array<i64: 1, 1>, scalar_prefetch = 0 : i64, scratch_operands = 0 : i64, tpu.core_type = #tpu.core_type<tc>, window_params = [{transform_indices = @transform_0, window_bounds = array<i64: 2, 4, 256>}, {transform_indices = @transform_1, window_bounds = array<i64: 2, 4, 256>}]} {
    %c0 = arith.constant 0 : index
    %c0_0 = arith.constant 0 : index
    %c0_1 = arith.constant 0 : index
    %0 = vector.load %arg2[%c0, %c0_0, %c0_1] : memref<2x4x256xf32, #tpu.memory_space<vmem>>, vector<2x4x256xf32>
    %c0_2 = arith.constant 0 : index
    %c0_3 = arith.constant 0 : index
    %c0_4 = arith.constant 0 : index
    %1 = vector.load %arg3[%c0_2, %c0_3, %c0_4] : memref<2x4x256xf32, #tpu.memory_space<vmem>>, vector<2x4x256xf32>
    tpu.vector_store %arg3[%c0_2, %c0_3, %c0_4], %0 {strides = array<i32>} : memref<2x4x256xf32, #tpu.memory_space<vmem>>, vector<2x4x256xf32>,
    return
  }
  func.func @transform_0(%arg0: i32, %arg1: i32) -> (i32, i32, i32) {
    %c0_i32 = arith.constant 0 : i32
    %c0_i32_0 = arith.constant 0 : i32
    return %arg0, %c0_i32, %arg1 : i32, i32, i32
  }
  func.func @transform_1(%arg0: i32, %arg1: i32) -> (i32, i32, i32) {
    %c0_i32 = arith.constant 0 : i32
    %c0_i32_0 = arith.constant 0 : i32
    return %arg0, %c0_i32, %arg1 : i32, i32, i32
  }
}

</mosaic_0001>

<bundles_post_ra>
// kernel: tpu_custom_call.1
= control target key start
LH: loop header
LB: loop body
LE: loop exit
PB: predicated region body
PF: predicated region fallthrough
CT: control target
= control target key end

     0   :  { %6 = vsyncpa [#allocation3], 0  ;;  %s112_s0 = inlined_call_operand.hbm [shape: f32[2,4,256], index: 0, kind: input, shape index: {}]   ;;  %s113_s1 = inlined_call_operand.hbm [shape: f32[2,4,256], index: 1, kind: output, shape index: {}]  }
   0x1   :  { %7 = vsyncpa [#allocation4], 0  ;;  %s92_s6 = smov [#allocation2]  }
   0x2   :  { %s13_s7 = sshll.u32 %s92_s6, 4  ;;  %s14_s7 = int_to_ptr.vmem [resolvable:$true] %s13_s7 }
   0x3   :  { %s56_s8 = scalar_lea.vmem %s14_s7, 256  ;;  %p61_p1 = scmp.lt.s32.totalorder %s14_s7, %s14_s7 }
   0x4   :  { %p57_p0 = scmp.ne.s32.totalorder %s14_s7, %s56_s8  ;;  %p62_p2 = scmp.lt.s32.totalorder %s56_s8, %s56_s8 }
   0x6   :  { %p63_p3 = por %p62_p2, %p61_p1 }
   0x8   :  { %p64_p4 = pnand %p63_p3, %p57_p0 }
   0xa   :  { %67 = shalt.err (!%p64_p4)
}
   0xb   :  { %s93_s9 = smov 128   ;;  %s94_s10 = smov 8  }
   0xc   :  { %19 = dma.hbm_to_vmem [thread:$0]  %s112_s0, 256, %s14_s7, [#allocation3], %s93_s9, %s93_s9, %s94_s10  }
   0xd   :  { %88 = dma.done.wait [#allocation3], 256  }
   0xe   :  { %89 = vsyncadd [#allocation3], 4294967040  ;;  %s95_s13 = smov [#allocation5]   ;;  %v23_v0 = vld [vmem:[#allocation2] sm:$0xff]  ;;  %v24_v1 = vld [vmem:[#allocation2 + $0x8] sm:$0xff] }
   0xf   :  { %s32_s14 = sshll.u32 %s95_s13, 4  ;;  %25 = vst [vmem:[#allocation5] sm:$0xff] %v23_v0  ;;  %26 = vst [vmem:[#allocation5 + $0x8] sm:$0xff] %v24_v1  ;;  %s33_s14 = int_to_ptr.vmem [resolvable:$true] %s32_s14 }
  0x10   :  { %s68_s15 = scalar_lea.vmem %s33_s14, 256  ;;  %p73_p6 = scmp.lt.s32.totalorder %s33_s14, %s33_s14 }
  0x11   :  { %p69_p5 = scmp.ne.s32.totalorder %s33_s14, %s68_s15  ;;  %p74_p7 = scmp.lt.s32.totalorder %s68_s15, %s68_s15 }
  0x13   :  { %p75_p8 = por %p74_p7, %p73_p6 }
  0x15   :  { %p76_p9 = pnand %p75_p8, %p69_p5 }
  0x17   :  { %79 = shalt.err (!%p76_p9)
}
  0x18   :  { %38 = dma.vmem_to_hbm [thread:$0]  %s33_s14, 256, %s113_s1, [#allocation4], %s93_s9, %s93_s9, %s94_s10  }
  0x19   :  { %90 = dma.done.wait [#allocation4], 256  }
  0x1a   :  { %91 = vsyncadd [#allocation4], 4294967040 }
  0x1b   :  { %42 = vsyncpa [#allocation3], 1 }
  0x1c   :  { %43 = vsyncpa [#allocation4], 1 }

</bundles_post_ra>
